<compile_context>
chip_gen: v6e
topology: v6e:2x2x1
jax: 0.10.0
libtpu: 0.0.40
codegen_flags: <defaults>
</compile_context>

<pallas_src>
import functools

import jax
import jax.numpy as jnp
from jax.experimental import pallas as pl
from jax.experimental.pallas import tpu as pltpu

LANE = 128
SUBLANE = 8


def _round_up(x, m):
    return ((x + m - 1) // m) * m


def _pick_divisor(extent, candidates):
    """Largest candidate that divides `extent` (candidates in descending order)."""
    for c in candidates:
        if c <= extent and extent % c == 0:
            return c
    return extent


# ----------------------------------------------------------------------------
# Tiled matmul kernel: O = X @ W, X: (Bp, Kp) f32, W: (Kp, Np) bf16, O f32.
# Grid = (Bp//tm, Np//tn, Kp//tk); reduction axis (K) last; the f32 output
# block is the accumulator (resident across the K axis), no scratch needed.
# ----------------------------------------------------------------------------
def _matmul_kernel(x_ref, w_ref, o_ref):
    @pl.when(pl.program_id(2) == 0)
    def _():
        o_ref[...] = jnp.zeros_like(o_ref)

    o_ref[...] += jnp.dot(
        x_ref[...].astype(w_ref.dtype),   # bf16 MXU pass, f32 accumulate
        w_ref[...],
        preferred_element_type=jnp.float32,
    )


@functools.partial(jax.jit, static_argnames=("n_out",))
def _apply_padded_weight(x, w_padded, *, n_out):
    """Returns (x @ w_padded)[:, :n_out] with x zero-padded to match w_padded."""
    B, K = x.shape
    Kp, Np = w_padded.shape
    assert K <= Kp and n_out <= Np

    Bp = _round_up(B, SUBLANE)
    if (Bp, Kp) != (B, K):
        x = jnp.pad(x, ((0, Bp - B), (0, Kp - K)))  # small activation only

    tm = _pick_divisor(Bp, (256, 128, 64, 32, 16, 8))
    tk = _pick_divisor(Kp, (1024, 512, 256, 128))
    tn = _pick_divisor(Np, (512, 256, 128))

    # v7x has 2 TensorCores: make sure at least one "parallel" grid axis has
    # >= 2 blocks when the padded extents allow it. Split N first (re-reading
    # the small x block is cheaper than re-reading the dominant W stream).
    if Bp // tm == 1 and Np // tn == 1:
        if Np >= 2 * LANE:
            tn = _pick_divisor(Np, tuple(c for c in (256, 128) if c <= Np // 2))
        elif Bp >= 2 * SUBLANE:
            tm = _pick_divisor(
                Bp, tuple(c for c in (128, 64, 32, 16, 8) if c <= Bp // 2)
            )

    grid = (Bp // tm, Np // tn, Kp // tk)

    cost = pl.CostEstimate(
        flops=2 * Bp * Kp * Np,
        transcendentals=0,
        bytes_accessed=Bp * Kp * 4 + Kp * Np * 2 + Bp * Np * 4,
    )

    out = pl.pallas_call(
        _matmul_kernel,
        out_shape=jax.ShapeDtypeStruct((Bp, Np), jnp.float32),
        grid_spec=pltpu.PrefetchScalarGridSpec(
            num_scalar_prefetch=0,
            grid=grid,
            in_specs=[
                pl.BlockSpec((tm, tk), lambda i, j, k: (i, k)),
                pl.BlockSpec((tk, tn), lambda i, j, k: (k, j)),
            ],
            out_specs=pl.BlockSpec((tm, tn), lambda i, j, k: (i, j)),
        ),
        compiler_params=pltpu.CompilerParams(
            dimension_semantics=("parallel", "parallel", "arbitrary"),
            vmem_limit_bytes=32 * 1024 * 1024,
        ),
        cost_estimate=cost,
    )(x, w_padded)

    if Bp != B or Np != n_out:
        out = out[:B, :n_out]
    return out


def _pad_weight(w):
    """Zero-pad (K, N) -> lane-aligned (Kp, Np) and cast to bf16 (done once)."""
    K, N = w.shape
    Kp, Np = _round_up(K, LANE), _round_up(N, LANE)
    wp = jnp.zeros((Kp, Np), jnp.bfloat16).at[:K, :N].set(w.astype(jnp.bfloat16))
    return wp, N


# ----------------------------------------------------------------------------
# Concrete "mean system response" operator mirroring BaseMeanSystemResponse.
# ----------------------------------------------------------------------------
class MeanSystemResponse:
    """A is a fixed dense (M, N) measurement matrix; forward(x) = A @ x."""

    def __init__(self, m, n, key):
        self.m, self.n = m, n
        # Master parameters in f32 (setup-time plain-JAX glue, not kernel path).
        self.A_mat = jax.random.normal(key, (m, n), dtype=jnp.float32) / jnp.sqrt(n)
        pinv_ata = jnp.linalg.pinv(self.A_mat.T @ self.A_mat).astype(jnp.float32)
        # Direct pseudoinverse for the fused A^+ application (better
        # conditioning than forming (A^T A)^+ A^T; mathematically identical).
        a_pinv_t = jnp.linalg.pinv(self.A_mat).T.astype(jnp.float32)  # (M, N)
        self._pinv_ata = pinv_ata  # kept for reference checks

        # Pre-padded bf16 weight operands — padded ONCE here, never per call.
        self._w_A, self._n_A = _pad_weight(self.A_mat.T)          # (B,N)->(B,M)
        self._w_AT, self._n_AT = _pad_weight(self.A_mat)          # (B,M)->(B,N)
        self._w_pATA, self._n_pATA = _pad_weight(pinv_ata)        # (B,N)->(B,N)
        self._w_pA, self._n_pA = _pad_weight(a_pinv_t)            # (B,M)->(B,N)

    def reset_random_state(self):
        # This concrete A has no stochastic component.
        pass

    def A(self, x):
        """Returns A @ x (per sample). x: (B, N) -> (B, M)."""
        return _apply_padded_weight(x, self._w_A, n_out=self._n_A)

    def AT(self, x):
        """Returns A^T @ x. x: (B, M) -> (B, N)."""
        return _apply_padded_weight(x, self._w_AT, n_out=self._n_AT)

    def pinvATA(self, x):
        """Returns (A^T A)^+ @ x. x: (B, N) -> (B, N)."""
        return _apply_padded_weight(x, self._w_pATA, n_out=self._n_pATA)

    def pinvA(self, x):
        """Returns A^+ @ x == pinvATA(AT(x)); fused into a single matmul."""
        return _apply_padded_weight(x, self._w_pA, n_out=self._n_pA)

    def forward(self, x):
        return self.A(x)

    __call__ = forward


if __name__ == "__main__":
    key = jax.random.PRNGKey(0)
    k_param, k_x = jax.random.split(key)

    B, M, N = 8, 16, 32  # batch, measurement dim, signal dim
    op = MeanSystemResponse(M, N, k_param)
    x = jax.random.normal(k_x, (B, N), dtype=jnp.float32)

    y = op(x)                    # forward = A(x): (B, M)
    jax.block_until_ready(y)
    z = op.AT(y)                 # (B, N)
    q = op.pinvATA(z)            # (B, N)
    p = op.pinvA(y)              # (B, N)
    jax.block_until_ready((z, q, p))

    # Correctness vs f32 references; tolerances are relaxed because the weight
    # operands are stored in bf16 (the MXU is a bf16-pass device anyway).
    y_ref = x @ op.A_mat.T
    z_ref = y_ref @ op.A_mat
    q_ref = z_ref @ op._pinv_ata
    p_ref = z_ref @ op._pinv_ata  # A^+ y == (A^T A)^+ A^T y
    assert y.shape == (B, M) and z.shape == (B, N)
    assert q.shape == (B, N) and p.shape == (B, N)
    assert jnp.allclose(y, y_ref, atol=1e-1, rtol=1e-1)
    assert jnp.allclose(z, z_ref, atol=1e-1, rtol=1e-1)
    assert jnp.allclose(q, q_ref, atol=1.5e-1, rtol=1.5e-1)
    assert jnp.allclose(p, p_ref, atol=1.5e-1, rtol=1.5e-1)

    print("KERNEL_OK")
</pallas_src>

<mosaic_0001>
module attributes {stable_mosaic.version = 11 : i64} {
  func.func @_matmul_kernel(%arg0: i32, %arg1: i32, %arg2: i32, %arg3: memref<8x128xf32, #tpu.memory_space<vmem>>, %arg4: memref<128x128xbf16, #tpu.memory_space<vmem>>, %arg5: memref<8x128xf32, #tpu.memory_space<vmem>>) attributes {dimension_semantics = [#tpu.dimension_semantics<parallel>, #tpu.dimension_semantics<parallel>, #tpu.dimension_semantics<arbitrary>], iteration_bounds = array<i64: 1, 1, 1>, scalar_prefetch = 0 : i64, scratch_operands = 0 : i64, tpu.core_type = #tpu.core_type<tc>, window_params = [{transform_indices = @transform_0, window_bounds = array<i64: 8, 128>}, {transform_indices = @transform_1, window_bounds = array<i64: 128, 128>}, {transform_indices = @transform_2, window_bounds = array<i64: 8, 128>}]} {
    %c0_i32 = arith.constant 0 : i32
    %0 = arith.cmpi eq, %arg2, %c0_i32 : i32
    %1 = arith.extui %0 : i1 to i32
    %c0_i32_0 = arith.constant 0 : i32
    %2 = arith.cmpi ne, %1, %c0_i32_0 : i32
    scf.if %2 {
      %cst_8 = arith.constant 0.000000e+00 : f32
      %10 = vector.broadcast %cst_8 : f32 to vector<8x128xf32>
      %c0_9 = arith.constant 0 : index
      %c0_10 = arith.constant 0 : index
      %11 = vector.load %arg5[%c0_9, %c0_10] : memref<8x128xf32, #tpu.memory_space<vmem>>, vector<8x128xf32>
      tpu.vector_store %arg5[%c0_9, %c0_10], %10 {strides = array<i32>} : memref<8x128xf32, #tpu.memory_space<vmem>>, vector<8x128xf32>,
    } else {
    }
    %c0 = arith.constant 0 : index
    %c0_1 = arith.constant 0 : index
    %3 = vector.load %arg5[%c0, %c0_1] : memref<8x128xf32, #tpu.memory_space<vmem>>, vector<8x128xf32>
    %c0_2 = arith.constant 0 : index
    %c0_3 = arith.constant 0 : index
    %4 = vector.load %arg3[%c0_2, %c0_3] : memref<8x128xf32, #tpu.memory_space<vmem>>, vector<8x128xf32>
    %5 = arith.truncf %4 : vector<8x128xf32> to vector<8x128xbf16>
    %c0_4 = arith.constant 0 : index
    %c0_5 = arith.constant 0 : index
    %6 = vector.load %arg4[%c0_4, %c0_5] : memref<128x128xbf16, #tpu.memory_space<vmem>>, vector<128x128xbf16>
    %cst = arith.constant dense<0.000000e+00> : vector<8x128xf32>
    %7 = tpu.matmul %5, %6, %cst {dimension_numbers = #tpu.dot_dimension_numbers<[1], [0], [0], [1], [0, 0, 1, 1], [], []>} : vector<8x128xbf16>, vector<128x128xbf16>, vector<8x128xf32> -> vector<8x128xf32>
    %8 = arith.addf %3, %7 : vector<8x128xf32>
    %c0_6 = arith.constant 0 : index
    %c0_7 = arith.constant 0 : index
    %9 = vector.load %arg5[%c0_6, %c0_7] : memref<8x128xf32, #tpu.memory_space<vmem>>, vector<8x128xf32>
    tpu.vector_store %arg5[%c0_6, %c0_7], %8 {strides = array<i32>} : memref<8x128xf32, #tpu.memory_space<vmem>>, vector<8x128xf32>,
    return
  }
  func.func @transform_0(%arg0: i32, %arg1: i32, %arg2: i32) -> (i32, i32) {
    %c0_i32 = arith.constant 0 : i32
    return %arg0, %arg2 : i32, i32
  }
  func.func @transform_1(%arg0: i32, %arg1: i32, %arg2: i32) -> (i32, i32) {
    %c0_i32 = arith.constant 0 : i32
    return %arg2, %arg1 : i32, i32
  }
  func.func @transform_2(%arg0: i32, %arg1: i32, %arg2: i32) -> (i32, i32) {
    %c0_i32 = arith.constant 0 : i32
    return %arg0, %arg1 : i32, i32
  }
}

</mosaic_0001>

<bundles_post_ra>
// kernel: _apply_padded_weight.1
= control target key start
LH: loop header
LB: loop body
LE: loop exit
PB: predicated region body
PF: predicated region fallthrough
CT: control target
= control target key end

     0   :  { %7 = vsyncpa [#allocation3], 0  ;;  %s281_s0 = inlined_call_operand.vmem [shape: f32[8,128], index: 0, kind: input, shape index: {}]   ;;  %s282_s1 = inlined_call_operand.hbm [shape: bf16[128,128], index: 1, kind: input, shape index: {}]   ;;  %s283_s2 = inlined_call_operand.hbm [shape: f32[8,128], index: 2, kind: output, shape index: {}]  }
   0x1   :  { %8 = vsyncpa [#allocation4], 0  ;;  %s251_s9 = smov [#allocation2]  }
   0x2   :  { %s16_s10 = sshll.u32 %s251_s9, 4  ;;  %s17_s10 = int_to_ptr.vmem [resolvable:$true] %s16_s10 }
   0x3   :  { %s215_s11 = scalar_lea.vmem %s17_s10, 1024  ;;  %p220_p1 = scmp.lt.s32.totalorder %s17_s10, %s17_s10 }
   0x4   :  { %p216_p0 = scmp.ne.s32.totalorder %s17_s10, %s215_s11  ;;  %p221_p2 = scmp.lt.s32.totalorder %s215_s11, %s215_s11 }
   0x6   :  { %p222_p3 = por %p221_p2, %p220_p1 }
   0x8   :  { %p223_p4 = pnand %p222_p3, %p216_p0 }
   0xa   :  { %226 = shalt.err (!%p223_p4)
}
   0xb   :  { %s252_s12 = smov 64   ;;  %s253_s13 = smov 4  }
   0xc   :  { %22 = dma.hbm_to_vmem [thread:$0]  %s282_s1, 1024, %s17_s10, [#allocation3], %s252_s12, %s252_s12, %s253_s13  }
   0xd   :  { %247 = dma.done.wait [#allocation3], 1024  }
   0xe   :  { %248 = vsyncadd [#allocation3], 4294966272  ;;  %v254_v0 = vmov 0.0   ;;  %vm255_vm0 = vmmov 0   ;;  %v199_v1 = vld [vmem:[#allocation2 + $0x38] sm:$0xff]   ;;  %v200_v2 = vld [vmem:[#allocation2 + $0x30] sm:$0xff]  }
   0xf   :  { %173 = vmatprep.subr.bf16.mxu0 %v254_v0  ;;  %189 = vmatprep.mubr.msk.bf16.mxu0 %vm255_vm0, %v254_v0  ;;  %v201_v3 = vld [vmem:[#allocation2 + $0x28] sm:$0xff]   ;;  %v202_v4 = vld [vmem:[#allocation2 + $0x20] sm:$0xff]   ;;  %v203_v5 = vld [vmem:[#allocation2 + $0x18] sm:$0xff]   ;;  %s256_s17 = smov [#allocation5]  }
  0x10   :  { %174 = vmatpush3.bf16.msra.mxu0 %v199_v1  ;;  %v204_v6 = vld [vmem:[#allocation2 + $0x10] sm:$0xff]   ;;  %v205_v7 = vld [vmem:[#allocation2 + $0x8] sm:$0xff]   ;;  %v206_v8 = vld [vmem:[#allocation2] sm:$0xff]   ;;  %s147_s18 = sshll.u32 %s256_s17, 4  ;;  %s148_s18 = int_to_ptr.vmem [resolvable:$true] %s147_s18 }
  0x11   :  { %175 = vmatprep.subr.bf16.mxu0 %v254_v0  ;;  %v33_v9 = vld [vmem:[%s281_s0] sm:$0xff]  ;;  %s227_s19 = scalar_lea.vmem %s148_s18, 128  ;;  %p232_p6 = scmp.lt.s32.totalorder %s148_s18, %s148_s18 }
  0x12   :  { %v34_v10 = vpack.c.bf16 %v33_v9, %v33_v9  ;;  %p228_p5 = scmp.ne.s32.totalorder %s148_s18, %s227_s19  ;;  %p233_p7 = scmp.lt.s32.totalorder %s227_s19, %s227_s19 }
  0x14   :  { %176 = vmatpush3.bf16.msra.mxu0 %v200_v2  ;;  %p234_p8 = por %p233_p7, %p232_p6 }
  0x15   :  { %177 = vmatprep.subr.bf16.mxu0 %v254_v0 }
  0x16   :  { %p235_p9 = pnand %p234_p8, %p228_p5 }
  0x18   :  { %178 = vmatpush3.bf16.msra.mxu0 %v201_v3 }
  0x19   :  { %179 = vmatprep.subr.bf16.mxu0 %v254_v0 }
  0x1c   :  { %180 = vmatpush3.bf16.msra.mxu0 %v202_v4 }
  0x1d   :  { %181 = vmatprep.subr.bf16.mxu0 %v254_v0 }
  0x20   :  { %182 = vmatpush3.bf16.msra.mxu0 %v203_v5 }
  0x21   :  { %183 = vmatprep.subr.bf16.mxu0 %v254_v0 }
  0x24   :  { %184 = vmatpush3.bf16.msra.mxu0 %v204_v6 }
  0x25   :  { %185 = vmatprep.subr.bf16.mxu0 %v254_v0 }
  0x28   :  { %186 = vmatpush3.bf16.msra.mxu0 %v205_v7 }
  0x29   :  { %187 = vmatprep.subr.bf16.mxu0 %v254_v0 }
  0x2c   :  { %188 = vmatpush3.bf16.msra.mxu0 %v206_v8 }
  0x2f   :  { %190 = vmatmul.mubr.bf16.vlgmr.msra.gmra.mxu0 %v34_v10 }
  0xef   :  { %v133_v11 = vpop.f32.mrf.mxu0 }
  0xf0   :  { %140 = vst [vmem:[#allocation5] sm:$0xff] %v133_v11 }
  0xf1   :  { %v191_v12 = vpop.f32.mrf.mxu0 }
  0xf3   :  { %v136_v13 = vpop.f32.mrf.mxu0 }
  0xf4   :  { %238 = shalt.err (!%p235_p9)
}
  0xf5   :  { %150 = dma.vmem_to_hbm [thread:$0]  %s148_s18, 128, %s283_s2, [#allocation4]   ;;  %v192_v14 = vpop.f32.mrf.mxu0 }
  0xf6   :  { %249 = dma.done.wait [#allocation4], 128  }
  0xf7   :  { %250 = vsyncadd [#allocation4], 4294967168 }
  0xf8   :  { %154 = vsyncpa [#allocation3], 1 }
  0xf9   :  { %155 = vsyncpa [#allocation4], 1 }

</bundles_post_ra>
